<compile_context>
chip_gen: v7x
topology: tpu7x:2x2x1
jax: 0.10.0
libtpu: 0.0.40
codegen_flags: <defaults>
</compile_context>

<pallas_src>
import jax
import jax.numpy as jnp
from jax.experimental import pallas as pl
from jax.experimental.pallas import tpu as pltpu

# ----- static configuration (BottomModelPlus defaults + num_layer=2) -----
BATCH = 8          # per-forward batch (BN statistics computed over this)
D_IN = 32
H = 10             # size_bottom_out
NUM_CLASSES = 10
NUM_LAYER = 2
USE_BN = True
ACT = "ReLU"       # 'ReLU' | 'Sigmoid' | 'None'
BN_EPS = 1e-5

LANES = 128            # lane-padded feature width
GROUPS_PER_STEP = 8    # batches-of-8 processed per grid step (per-step block = 64 rows)

# ----- packed parameter slab layout: one (N_ROWS, 128) f32 buffer -----
ROW_W_BOT = 0                          # rows [0, D_IN) : bottom Linear weight (D_IN, 128)
ROW_B_BOT = ROW_W_BOT + D_IN           # 1 row          : bottom Linear bias
ROW_B_FC = ROW_B_BOT + 1               # 4 rows         : fc_1..fc_4 biases
ROW_BN_GAMMA = ROW_B_FC + 4            # 5 rows         : bn_1..bn_4, bn_final gamma
ROW_BN_BETA = ROW_BN_GAMMA + 5         # 5 rows         : bn_1..bn_4, bn_final beta
ROW_B_FIN = ROW_BN_BETA + 5            # 1 row          : fc_final bias
N_ROWS_RAW = ROW_B_FIN + 1
N_ROWS = ((N_ROWS_RAW + 7) // 8) * 8   # sublane-align (48)


def _activation(x):
    if ACT == "ReLU":
        return jnp.maximum(x, 0.0)
    if ACT == "Sigmoid":
        return jax.nn.sigmoid(x)
    return x


def _batchnorm_train(x, gamma, beta):
    # Training-mode BatchNorm1d over the per-forward batch (axis=1 of (G, 8, 128)).
    # Centered variance (matches PyTorch, avoids cancellation at B=8); the rsqrt
    # lands on the EUP slot, the two reductions are cheap sublane reduces.
    mean = jnp.mean(x, axis=1, keepdims=True)
    diff = x - mean
    var = jnp.mean(diff * diff, axis=1, keepdims=True)
    scale = gamma * jax.lax.rsqrt(var + BN_EPS)
    shift = beta - mean * scale
    return x * scale + shift


def bottom_model_plus_kernel(
    x_ref,    # (G, BATCH, D_IN)   G independent batches-of-8
    p_ref,    # (N_ROWS, 128)      packed parameter slab (VMEM-resident across steps)
    out_ref,  # (G, BATCH, 128)    lane-dense output; first NUM_CLASSES cols are real
):
    g = x_ref.shape[0]

    # Lane mask selecting the real H feature columns (padded lanes stay exactly 0).
    col = jax.lax.broadcasted_iota(jnp.int32, (1, 1, LANES), 2)
    feat_mask = col < H

    # bottom model: Linear(D_IN -> H), lane-padded to 128 (padded weight columns
    # and bias are 0 => padded activation columns are exactly 0).  One batched
    # (G*8, 32) @ (32, 128) MXU matmul — weight push amortized over G batches.
    w_bot = p_ref[ROW_W_BOT:ROW_W_BOT + D_IN, :]
    b_bot = p_ref[ROW_B_BOT:ROW_B_BOT + 1, :]
    x2d = x_ref[...].reshape(g * BATCH, D_IN)
    h2d = jnp.dot(x2d, w_bot, preferred_element_type=jnp.float32) + b_bot
    x = h2d.reshape(g, BATCH, LANES)

    # hidden layers: num_layer >= 2 -> bn_1 / act / fc_1, >= 3 -> bn_2 / fc_2, ...
    for layer in range(NUM_LAYER - 1):
        if USE_BN:
            gamma = p_ref[ROW_BN_GAMMA + layer:ROW_BN_GAMMA + layer + 1, :].reshape(1, 1, LANES)
            beta = p_ref[ROW_BN_BETA + layer:ROW_BN_BETA + layer + 1, :].reshape(1, 1, LANES)
            x = _batchnorm_train(x, gamma, beta)
        x = _activation(x)
        # fc_k has an all-ones (H x H) weight (weights_init_ones), so x @ W is the
        # row-sum broadcast across the H real columns: XLU lane-reduce instead of
        # an MXU round-trip.  The mask keeps padded lanes at exactly 0 so the
        # downstream BN / row-sums stay correct.
        row_sum = jnp.sum(x, axis=-1, keepdims=True)
        b_fc = p_ref[ROW_B_FC + layer:ROW_B_FC + layer + 1, :].reshape(1, 1, LANES)
        x = jnp.where(feat_mask, row_sum + b_fc, 0.0)

    # final block: bn_final -> activation -> fc_final (all-ones weight => row-sum).
    if USE_BN:
        gamma = p_ref[ROW_BN_GAMMA + 4:ROW_BN_GAMMA + 5, :].reshape(1, 1, LANES)
        beta = p_ref[ROW_BN_BETA + 4:ROW_BN_BETA + 5, :].reshape(1, 1, LANES)
        x = _batchnorm_train(x, gamma, beta)
    x = _activation(x)
    row_sum = jnp.sum(x, axis=-1, keepdims=True)
    b_fin = p_ref[ROW_B_FIN:ROW_B_FIN + 1, :].reshape(1, 1, LANES)
    # Padded output lanes hold row_sum + 0; they are sliced off in the wrapper.
    out_ref[...] = (row_sum + b_fin).astype(out_ref.dtype)


@jax.jit
def bottom_model_plus(x, packed_params):
    """x: (N, BATCH, D_IN) stacked batches-of-8, or a single (BATCH, D_IN) batch."""
    squeeze = x.ndim == 2
    if squeeze:
        x = x[None]
    n, b, d = x.shape
    assert b == BATCH and d == D_IN
    g = min(GROUPS_PER_STEP, n)
    assert n % g == 0, "number of stacked batches must divide the group size"
    grid = (n // g,)

    # Advisory cost estimate so XLA schedules neighboring ops sensibly.
    flops = 2 * n * BATCH * D_IN * LANES + 40 * n * BATCH * LANES
    transcendentals = 2 * n * LANES                       # rsqrt per BN layer per batch
    bytes_accessed = (x.size + N_ROWS * LANES + n * BATCH * LANES) * 4

    out_padded = pl.pallas_call(
        bottom_model_plus_kernel,
        out_shape=jax.ShapeDtypeStruct((n, BATCH, LANES), jnp.float32),
        grid=grid,
        in_specs=[
            pl.BlockSpec((g, BATCH, D_IN), lambda i: (i, 0, 0)),
            # Constant block index: the 24 KiB slab stays resident in VMEM across
            # all grid steps (no per-step DMA).
            pl.BlockSpec((N_ROWS, LANES), lambda i: (0, 0)),
        ],
        out_specs=pl.BlockSpec((g, BATCH, LANES), lambda i: (i, 0, 0)),
        compiler_params=pltpu.CompilerParams(dimension_semantics=("parallel",)),
        cost_estimate=pl.CostEstimate(
            flops=flops, transcendentals=transcendentals, bytes_accessed=bytes_accessed),
    )(x, packed_params)

    out = out_padded[..., :NUM_CLASSES]   # fused into the same jitted executable
    if squeeze:
        out = out[0]
    return out


def make_params(key):
    """Build the packed (N_ROWS, 128) parameter slab."""
    k1, k2, k3, k4 = jax.random.split(key, 4)
    slab = jnp.zeros((N_ROWS, LANES), jnp.float32)

    # bottom_model: deterministic Linear(D_IN -> H) stand-in for the external module.
    w_bot = jax.random.normal(k1, (D_IN, H), jnp.float32) * 0.1
    b_bot = jax.random.normal(k2, (1, H), jnp.float32) * 0.01
    slab = slab.at[ROW_W_BOT:ROW_W_BOT + D_IN, :H].set(w_bot)
    slab = slab.at[ROW_B_BOT, :H].set(b_bot[0])

    # fc_1..fc_4: all-ones weights (weights_init_ones) are implicit row-sums in the
    # kernel; biases keep a deterministic PRNG stand-in for PyTorch's default init.
    bound = 1.0 / jnp.sqrt(jnp.float32(H))
    b_fc = jax.random.uniform(k3, (4, H), jnp.float32, minval=-bound, maxval=bound)
    slab = slab.at[ROW_B_FC:ROW_B_FC + 4, :H].set(b_fc)

    # BatchNorm1d default affine init: gamma = 1, beta = 0 (beta rows stay zero —
    # the padded-lane == 0 invariant depends on it).
    slab = slab.at[ROW_BN_GAMMA:ROW_BN_GAMMA + 5, :].set(1.0)

    # fc_final: all-ones weight (implicit row-sum); deterministic bias.
    b_fin = jax.random.uniform(k4, (1, NUM_CLASSES), jnp.float32,
                               minval=-bound, maxval=bound)
    slab = slab.at[ROW_B_FIN, :NUM_CLASSES].set(b_fin[0])
    return slab


def reference_forward(x, slab):
    """Pure-JAX reference (per batch-of-8, training-mode BN) for correctness check."""
    w_bot = slab[ROW_W_BOT:ROW_W_BOT + D_IN, :H]
    b_bot = slab[ROW_B_BOT, :H]

    def act(h):
        if ACT == "ReLU":
            return jnp.maximum(h, 0.0)
        if ACT == "Sigmoid":
            return jax.nn.sigmoid(h)
        return h

    def bn(h, gamma, beta):
        mean = h.mean(axis=0)
        var = ((h - mean) ** 2).mean(axis=0)
        return (h - mean) * gamma / jnp.sqrt(var + BN_EPS) + beta

    def per_batch(xb):
        h = xb @ w_bot + b_bot
        for layer in range(NUM_LAYER - 1):
            if USE_BN:
                h = bn(h, slab[ROW_BN_GAMMA + layer, :H], slab[ROW_BN_BETA + layer, :H])
            h = act(h)
            h = jnp.sum(h, axis=-1, keepdims=True) + slab[ROW_B_FC + layer, :H]
        if USE_BN:
            h = bn(h, slab[ROW_BN_GAMMA + 4, :H], slab[ROW_BN_BETA + 4, :H])
        h = act(h)
        return jnp.sum(h, axis=-1, keepdims=True) + slab[ROW_B_FIN, :NUM_CLASSES]

    return jax.vmap(per_batch)(x)


if __name__ == "__main__":
    key = jax.random.PRNGKey(0)
    kx, kp = jax.random.split(key)
    n_batches = 16   # 16 stacked forward calls of batch 8 each -> grid of 2 steps
    x = jax.random.normal(kx, (n_batches, BATCH, D_IN), jnp.float32)
    params = make_params(kp)

    # Explicit checks of the load-bearing padded-lane invariants (review request).
    assert float(jnp.abs(params[ROW_W_BOT:ROW_W_BOT + D_IN, H:]).max()) == 0.0
    assert float(jnp.abs(params[ROW_B_BOT, H:]).max()) == 0.0
    assert float(jnp.abs(params[ROW_BN_BETA:ROW_BN_BETA + 5, H:]).max()) == 0.0

    out = bottom_model_plus(x, params)
    jax.block_until_ready(out)
    assert out.shape == (n_batches, BATCH, NUM_CLASSES)
    assert out.dtype == jnp.float32

    ref = reference_forward(x, params)
    assert jnp.allclose(out, ref, atol=1e-4, rtol=1e-4), float(jnp.abs(out - ref).max())
    print("KERNEL_OK")
</pallas_src>

<mosaic_0001>
module attributes {stable_mosaic.version = 11 : i64} {
  func.func @bottom_model_plus_kernel(%arg0: i32, %arg1: memref<8x8x32xf32, #tpu.memory_space<vmem>>, %arg2: memref<48x128xf32, #tpu.memory_space<vmem>>, %arg3: memref<8x8x128xf32, #tpu.memory_space<vmem>>) attributes {dimension_semantics = [#tpu.dimension_semantics<parallel>], iteration_bounds = array<i64: 2>, scalar_prefetch = 0 : i64, scratch_operands = 0 : i64, tpu.core_type = #tpu.core_type<tc>, window_params = [{transform_indices = @transform_0, window_bounds = array<i64: 8, 8, 32>}, {pipeline_mode = #tpu.pipeline_mode<synchronous>, transform_indices = @transform_1, window_bounds = array<i64: 48, 128>}, {transform_indices = @transform_2, window_bounds = array<i64: 8, 8, 128>}]} {
    %0 = tpu.iota {dimensions = array<i32: 2>} : vector<1x1x128xi32>
    %c10_i32 = arith.constant 10 : i32
    %1 = vector.broadcast %c10_i32 : i32 to vector<1x1x128xi32>
    %2 = arith.cmpi slt, %0, %1 : vector<1x1x128xi32>
    %c0 = arith.constant 0 : index
    %c0_0 = arith.constant 0 : index
    %3 = vector.load %arg2[%c0, %c0_0] : memref<48x128xf32, #tpu.memory_space<vmem>>, vector<32x128xf32>
    %c32 = arith.constant 32 : index
    %c0_1 = arith.constant 0 : index
    %4 = vector.load %arg2[%c32, %c0_1] : memref<48x128xf32, #tpu.memory_space<vmem>>, vector<1x128xf32>
    %c0_2 = arith.constant 0 : index
    %c0_3 = arith.constant 0 : index
    %c0_4 = arith.constant 0 : index
    %5 = vector.load %arg1[%c0_2, %c0_3, %c0_4] : memref<8x8x32xf32, #tpu.memory_space<vmem>>, vector<8x8x32xf32>
    %6 = vector.shape_cast %5 : vector<8x8x32xf32> to vector<64x32xf32>
    %cst = arith.constant dense<0.000000e+00> : vector<64x128xf32>
    %7 = tpu.matmul %6, %3, %cst {dimension_numbers = #tpu.dot_dimension_numbers<[1], [0], [0], [1], [0, 0, 1, 1], [], []>} : vector<64x32xf32>, vector<32x128xf32>, vector<64x128xf32> -> vector<64x128xf32>
    %8 = vector.broadcast %4 : vector<1x128xf32> to vector<64x128xf32>
    %9 = arith.addf %7, %8 : vector<64x128xf32>
    %10 = vector.shape_cast %9 : vector<64x128xf32> to vector<8x8x128xf32>
    %c37 = arith.constant 37 : index
    %c0_5 = arith.constant 0 : index
    %11 = vector.load %arg2[%c37, %c0_5] : memref<48x128xf32, #tpu.memory_space<vmem>>, vector<1x128xf32>
    %12 = vector.shape_cast %11 : vector<1x128xf32> to vector<1x1x128xf32>
    %c42 = arith.constant 42 : index
    %c0_6 = arith.constant 0 : index
    %13 = vector.load %arg2[%c42, %c0_6] : memref<48x128xf32, #tpu.memory_space<vmem>>, vector<1x128xf32>
    %14 = vector.shape_cast %13 : vector<1x128xf32> to vector<1x1x128xf32>
    %cst_7 = arith.constant dense<0.000000e+00> : vector<8x128xf32>
    %15 = vector.multi_reduction <add>, %10, %cst_7 [1] : vector<8x8x128xf32> to vector<8x128xf32>
    %16 = vector.shape_cast %15 : vector<8x128xf32> to vector<8x1x128xf32>
    %cst_8 = arith.constant 8.000000e+00 : f32
    %17 = vector.broadcast %cst_8 : f32 to vector<8x1x128xf32>
    %18 = arith.divf %16, %17 : vector<8x1x128xf32>
    %19 = vector.broadcast %18 : vector<8x1x128xf32> to vector<8x8x128xf32>
    %20 = arith.subf %10, %19 : vector<8x8x128xf32>
    %21 = arith.mulf %20, %20 : vector<8x8x128xf32>
    %cst_9 = arith.constant dense<0.000000e+00> : vector<8x128xf32>
    %22 = vector.multi_reduction <add>, %21, %cst_9 [1] : vector<8x8x128xf32> to vector<8x128xf32>
    %23 = vector.shape_cast %22 : vector<8x128xf32> to vector<8x1x128xf32>
    %cst_10 = arith.constant 8.000000e+00 : f32
    %24 = vector.broadcast %cst_10 : f32 to vector<8x1x128xf32>
    %25 = arith.divf %23, %24 : vector<8x1x128xf32>
    %cst_11 = arith.constant 9.99999974E-6 : f32
    %26 = vector.broadcast %cst_11 : f32 to vector<8x1x128xf32>
    %27 = arith.addf %25, %26 : vector<8x1x128xf32>
    %28 = math.rsqrt %27 : vector<8x1x128xf32>
    %29 = vector.broadcast %12 : vector<1x1x128xf32> to vector<8x1x128xf32>
    %30 = arith.mulf %29, %28 : vector<8x1x128xf32>
    %31 = arith.mulf %18, %30 : vector<8x1x128xf32>
    %32 = vector.broadcast %14 : vector<1x1x128xf32> to vector<8x1x128xf32>
    %33 = arith.subf %32, %31 : vector<8x1x128xf32>
    %34 = vector.broadcast %30 : vector<8x1x128xf32> to vector<8x8x128xf32>
    %35 = arith.mulf %10, %34 : vector<8x8x128xf32>
    %36 = vector.broadcast %33 : vector<8x1x128xf32> to vector<8x8x128xf32>
    %37 = arith.addf %35, %36 : vector<8x8x128xf32>
    %cst_12 = arith.constant 0.000000e+00 : f32
    %38 = vector.broadcast %cst_12 : f32 to vector<8x8x128xf32>
    %39 = arith.maximumf %37, %38 : vector<8x8x128xf32>
    %cst_13 = arith.constant dense<0.000000e+00> : vector<8x8xf32>
    %40 = vector.multi_reduction <add>, %39, %cst_13 [2] : vector<8x8x128xf32> to vector<8x8xf32>
    %41 = vector.shape_cast %40 : vector<8x8xf32> to vector<8x8x1xf32>
    %c33 = arith.constant 33 : index
    %c0_14 = arith.constant 0 : index
    %42 = vector.load %arg2[%c33, %c0_14] : memref<48x128xf32, #tpu.memory_space<vmem>>, vector<1x128xf32>
    %43 = vector.shape_cast %42 : vector<1x128xf32> to vector<1x1x128xf32>
    %44 = vector.broadcast %41 : vector<8x8x1xf32> to vector<8x8x128xf32>
    %45 = vector.broadcast %43 : vector<1x1x128xf32> to vector<8x8x128xf32>
    %46 = arith.addf %44, %45 : vector<8x8x128xf32>
    %cst_15 = arith.constant 0.000000e+00 : f32
    %47 = vector.shape_cast %2 : vector<1x1x128xi1> to vector<1x1x128xi1>
    %48 = vector.broadcast %47 : vector<1x1x128xi1> to vector<8x8x128xi1>
    %49 = vector.broadcast %cst_15 : f32 to vector<8x8x128xf32>
    %50 = arith.select %48, %46, %49 : vector<8x8x128xi1>, vector<8x8x128xf32>
    %c41 = arith.constant 41 : index
    %c0_16 = arith.constant 0 : index
    %51 = vector.load %arg2[%c41, %c0_16] : memref<48x128xf32, #tpu.memory_space<vmem>>, vector<1x128xf32>
    %52 = vector.shape_cast %51 : vector<1x128xf32> to vector<1x1x128xf32>
    %c46 = arith.constant 46 : index
    %c0_17 = arith.constant 0 : index
    %53 = vector.load %arg2[%c46, %c0_17] : memref<48x128xf32, #tpu.memory_space<vmem>>, vector<1x128xf32>
    %54 = vector.shape_cast %53 : vector<1x128xf32> to vector<1x1x128xf32>
    %cst_18 = arith.constant dense<0.000000e+00> : vector<8x128xf32>
    %55 = vector.multi_reduction <add>, %50, %cst_18 [1] : vector<8x8x128xf32> to vector<8x128xf32>
    %56 = vector.shape_cast %55 : vector<8x128xf32> to vector<8x1x128xf32>
    %cst_19 = arith.constant 8.000000e+00 : f32
    %57 = vector.broadcast %cst_19 : f32 to vector<8x1x128xf32>
    %58 = arith.divf %56, %57 : vector<8x1x128xf32>
    %59 = vector.broadcast %58 : vector<8x1x128xf32> to vector<8x8x128xf32>
    %60 = arith.subf %50, %59 : vector<8x8x128xf32>
    %61 = arith.mulf %60, %60 : vector<8x8x128xf32>
    %cst_20 = arith.constant dense<0.000000e+00> : vector<8x128xf32>
    %62 = vector.multi_reduction <add>, %61, %cst_20 [1] : vector<8x8x128xf32> to vector<8x128xf32>
    %63 = vector.shape_cast %62 : vector<8x128xf32> to vector<8x1x128xf32>
    %cst_21 = arith.constant 8.000000e+00 : f32
    %64 = vector.broadcast %cst_21 : f32 to vector<8x1x128xf32>
    %65 = arith.divf %63, %64 : vector<8x1x128xf32>
    %cst_22 = arith.constant 9.99999974E-6 : f32
    %66 = vector.broadcast %cst_22 : f32 to vector<8x1x128xf32>
    %67 = arith.addf %65, %66 : vector<8x1x128xf32>
    %68 = math.rsqrt %67 : vector<8x1x128xf32>
    %69 = vector.broadcast %52 : vector<1x1x128xf32> to vector<8x1x128xf32>
    %70 = arith.mulf %69, %68 : vector<8x1x128xf32>
    %71 = arith.mulf %58, %70 : vector<8x1x128xf32>
    %72 = vector.broadcast %54 : vector<1x1x128xf32> to vector<8x1x128xf32>
    %73 = arith.subf %72, %71 : vector<8x1x128xf32>
    %74 = vector.broadcast %70 : vector<8x1x128xf32> to vector<8x8x128xf32>
    %75 = arith.mulf %50, %74 : vector<8x8x128xf32>
    %76 = vector.broadcast %73 : vector<8x1x128xf32> to vector<8x8x128xf32>
    %77 = arith.addf %75, %76 : vector<8x8x128xf32>
    %cst_23 = arith.constant 0.000000e+00 : f32
    %78 = vector.broadcast %cst_23 : f32 to vector<8x8x128xf32>
    %79 = arith.maximumf %77, %78 : vector<8x8x128xf32>
    %cst_24 = arith.constant dense<0.000000e+00> : vector<8x8xf32>
    %80 = vector.multi_reduction <add>, %79, %cst_24 [2] : vector<8x8x128xf32> to vector<8x8xf32>
    %81 = vector.shape_cast %80 : vector<8x8xf32> to vector<8x8x1xf32>
    %c47 = arith.constant 47 : index
    %c0_25 = arith.constant 0 : index
    %82 = vector.load %arg2[%c47, %c0_25] : memref<48x128xf32, #tpu.memory_space<vmem>>, vector<1x128xf32>
    %83 = vector.shape_cast %82 : vector<1x128xf32> to vector<1x1x128xf32>
    %84 = vector.broadcast %81 : vector<8x8x1xf32> to vector<8x8x128xf32>
    %85 = vector.broadcast %83 : vector<1x1x128xf32> to vector<8x8x128xf32>
    %86 = arith.addf %84, %85 : vector<8x8x128xf32>
    %c0_26 = arith.constant 0 : index
    %c0_27 = arith.constant 0 : index
    %c0_28 = arith.constant 0 : index
    %87 = vector.load %arg3[%c0_26, %c0_27, %c0_28] : memref<8x8x128xf32, #tpu.memory_space<vmem>>, vector<8x8x128xf32>
    tpu.vector_store %arg3[%c0_26, %c0_27, %c0_28], %86 {strides = array<i32>} : memref<8x8x128xf32, #tpu.memory_space<vmem>>, vector<8x8x128xf32>,
    return
  }
  func.func @transform_0(%arg0: i32) -> (i32, i32, i32) {
    %c0_i32 = arith.constant 0 : i32
    %c0_i32_0 = arith.constant 0 : i32
    %c0_i32_1 = arith.constant 0 : i32
    return %arg0, %c0_i32, %c0_i32_0 : i32, i32, i32
  }
  func.func @transform_1(%arg0: i32) -> (i32, i32) {
    %c0_i32 = arith.constant 0 : i32
    %c0_i32_0 = arith.constant 0 : i32
    %c0_i32_1 = arith.constant 0 : i32
    return %c0_i32, %c0_i32_0 : i32, i32
  }
  func.func @transform_2(%arg0: i32) -> (i32, i32, i32) {
    %c0_i32 = arith.constant 0 : i32
    %c0_i32_0 = arith.constant 0 : i32
    %c0_i32_1 = arith.constant 0 : i32
    return %arg0, %c0_i32, %c0_i32_0 : i32, i32, i32
  }
}

</mosaic_0001>

<bundles_post_ra>
// kernel: bottom_model_plus.1
= control target key start
LH: loop header
LB: loop body
LE: loop exit
PB: predicated region body
PF: predicated region fallthrough
CT: control target
= control target key end

     0   :  { %7 = vsyncpa [#allocation3], 0  ;;  %s1666_s0 = inlined_call_operand.hbm [shape: f32[16,8,32], index: 0, kind: input, shape index: {}]   ;;  %s1667_s1 = inlined_call_operand.hbm [shape: f32[48,128], index: 1, kind: input, shape index: {}]   ;;  %s1668_s2 = inlined_call_operand.vmem [shape: f32[16,8,128], index: 2, kind: output, shape index: {}]  }
   0x1   :  { %9 = vsyncpa [#allocation3 + $0x1], 0 }
   0x2   :  { %10 = vsyncpa [#allocation5], 0  ;;  %s1273_s9 = smov 0   ;;  %s1275_s10 = smov 0  }
   0x3   :  { %s1277_s11 = smov 0   ;;  %s1279_s12 = smov 0  }
   0x4 LB: > { %s1001_s13 = sadd.s32 4294967295, %s1252_s12   ;;  %p36_p0 = scmp.ne.s32.totalorder %s1244_s10, %s1240_s9  ;;  %s1252_s12 = sphi %s1279_s12, %s1684_s12   ;;  %s1248_s11 = sphi %s1277_s11, %s1683_s11   ;;  %s1244_s10 = sphi %s1275_s10, %s1682_s10   ;;  %s1240_s9 = sphi %s1273_s9, %s1681_s9  }
   0x5   : > { %p1295_p1 = scmp.eq.s32.totalorder %s1001_s13, 0  ;;  %p1003_p2 = scmp.ge.s32.totalorder %s1252_s12, 1 }
   0x6   : > { %p94_p3 = scmp.lt.s32.totalorder %s1252_s12, 3  ;;  %s1254_s17 = smov [#allocation4]  }
   0x7   : > { %s1673_s14 = scalar_select %p1295_p1, 1, 0 }
   0x8   : > { %p1303_p4 = por %p1295_p1, %p36_p0  ;;  %p1307_p5 = pnand %p1003_p2, %p94_p3 }
   0x9   : > { %s106_s18 = sshll.u32 %s1254_s17, 4  ;;  %s1320_s20 = sadd.s32 1, %s1252_s12   ;;  %s107_s18 = int_to_ptr.vmem [resolvable:$true] %s106_s18 }
   0xa   : > { %s1674_s15 = scalar_select %p1303_p4, 1, 0 }
   0xb   : > { %s1675_s16 = scalar_select %p1307_p5, 1, 0 }
   0xc   : > { %p1078_p6 = pneg %p1307_p5  ;;  %s23_s21 = sadd.s32 1, %s1248_s11 }
   0xd   : > { %s20_s22 = ssub.s32 %s1252_s12, %s1320_s20  ;;  %s1156_s25 = scalar_lea.hbm %s1667_s1, 768 }
   0xe   : > { %p1315_p7 = pnand %p1078_p6, %p1295_p1  ;;  %p1157_p8 = scmp.ne.s32.totalorder %s1667_s1, %s1156_s25 }
   0xf   : > { %p1163_p12 = scmp.lt.u32.totalorder %s1156_s25, %s1667_s1 }
  0x10   : > { %p1158_p9 = pneg %p1315_p7 }
  0x12   : > { %p1159_p10 = pnand %p1158_p9, %p1157_p8 }
  0x14   : > { %p1160_p11 = pneg %p1159_p10 }
  0x16   : > { %p1165_p13 = pnand %p1163_p12, %p1160_p11 }
  0x18   : > { %1168 = shalt.err (!%p1165_p13)
}
  0x19   : > { %s1169_s30 = scalar_lea.vmem %s107_s18, 768  ;;  %p1177_p6 = scmp.lt.s32.totalorder %s107_s18, %s107_s18 }
  0x1a   : > { %p1170_p0 = scmp.ne.s32.totalorder %s107_s18, %s1169_s30  ;;  %p1178_p1 = scmp.lt.s32.totalorder %s1169_s30, %s1169_s30 }
  0x1c   : > { %p1172_p2 = pnand %p1170_p0, %p1158_p9  ;;  %p1179_p4 = por %p1178_p1, %p1177_p6 }
  0x1e   : > { %p1173_p3 = pneg %p1172_p2 }
  0x20   : > { %p1180_p5 = pnand %p1179_p4, %p1173_p3 }
  0x22   : > { %1183 = shalt.err (!%p1180_p5)
}
  0x23   : > { %s1255_s3 = smov 128   ;;  %s1256_s4 = smov 8  }
  0x24   : > { %1081 = dma.hbm_to_vmem [thread:$0]  (!%p1315_p7), %s1667_s1, 768, %s107_s18, [#allocation5], %s1255_s3, %s1255_s3, %s1256_s4  }
  0x25   : > { %p21_p1 = scmp.eq.s32.totalorder %s20_s22, 0  ;;  %p30_p4 = scmp.ne.s32.totalorder %s1248_s11, %s1244_s10 }
  0x26   : > { %p31_p5 = scmp.eq.s32.totalorder %s1252_s12, 0  ;;  %p1087_p8 = scmp.lt.s32.totalorder %s1252_s12, 2 }
  0x27   : > { %s1349_s7 = scalar_select %p21_p1, %s1248_s11, %s23_s21  }
  0x28   : > { %p32_p9 = por %p31_p5, %p30_p4  ;;  %s120_s8 = sand.u32 1, %s1248_s11  }
  0x29   : > { %s1006_s9 = sshll.u32 %s120_s8, 6  ;;  %s1027_s17 = sshll.u32 %s1252_s12, 10 }
  0x2a   : > { %s1356_s19 = scalar_lea.hbm %s1666_s0, %s1027_s17  ;;  %s124_s18 = scalar_lea.vmem [#allocation2], %s1006_s9 }
  0x2b   : > { %s131_s22 = sshll.u32 %s124_s18, 4  ;;  %p1360_p7 = pnand %p1087_p8, %p32_p9  ;;  %s1358_s22 = int_to_ptr.vmem [resolvable:$true] %s131_s22 }
  0x2c   : > { %s1364_s25 = scalar_lea.sflag [#allocation3], %s120_s8  ;;  %s1184_s26 = scalar_lea.hbm %s1356_s19, 1024 }
  0x2d   : > { %p1185_p10 = scmp.ne.s32.totalorder %s1356_s19, %s1184_s26  ;;  %p1186_p11 = pneg %p1360_p7 }
  0x2e   : > { %s1189_s29 = scalar_lea.hbm %s1666_s0, 2048  ;;  %p1190_p0 = scmp.lt.u32.totalorder %s1356_s19, %s1666_s0 }
  0x2f   : > { %p1187_p12 = pnand %p1186_p11, %p1185_p10  ;;  %p1191_p2 = scmp.lt.u32.totalorder %s1189_s29, %s1184_s26 }
  0x30   : > { %p1193_p6 = scmp.lt.u32.totalorder %s1184_s26, %s1356_s19 }
  0x31   : > { %p1188_p13 = pneg %p1187_p12  ;;  %p1192_p3 = por %p1191_p2, %p1190_p0 }
  0x33   : > { %p1194_p1 = por %p1193_p6, %p1192_p3 }
  0x35   : > { %p1195_p4 = pnand %p1194_p1, %p1188_p13 }
  0x37   : > { %1198 = shalt.err (!%p1195_p4)
}
  0x38   : > { %s1199_s6 = scalar_lea.vmem %s1358_s22, 1024  ;;  %s1257_s8 = smov [#allocation2]  }
  0x39   : > { %p1200_p5 = scmp.ne.s32.totalorder %s1358_s22, %s1199_s6  ;;  %s1204_s9 = sshll.u32 %s1257_s8, 4  ;;  %s1205_s9 = int_to_ptr.vmem [resolvable:$false] %s1204_s9 }
  0x3a   : > { %s1206_s17 = scalar_lea.vmem %s1205_s9, 2048  ;;  %p1207_p10 = scmp.lt.s32.totalorder %s1358_s22, %s1205_s9 }
  0x3b   : > { %p1202_p8 = pnand %p1200_p5, %p1186_p11  ;;  %p1208_p12 = scmp.lt.s32.totalorder %s1206_s17, %s1199_s6 }
  0x3d   : > { %p1203_p9 = pneg %p1202_p8  ;;  %p1209_p0 = por %p1208_p12, %p1207_p10 }
  0x3f   : > { %p1210_p2 = pnand %p1209_p0, %p1203_p9 }
  0x41   : > { %1213 = shalt.err (!%p1210_p2)
}
  0x42   : > { %1085 = dma.hbm_to_vmem [thread:$0]  (!%p1360_p7), %s1356_s19, 1024, %s1358_s22, %s1364_s25, %s1255_s3, %s1255_s3, %s1256_s4  }
  0x43   : > { %p1678_p11 = scmp.ne.s32.totalorder %s1675_s16, 0 }
  0x44   : > { %s145_s23 = sand.u32 (!%p1678_p11), 1, %s1244_s10   ;;  %p1679_p13 = scmp.ne.s32.totalorder (!%p1678_p11), %s1674_s15, 0 }
  0x45   : > { %143 = sbr.rel (%p1678_p11) target bundleno = 725 (0x2d5), region = 28  ;;  %s1010_s24 = sshll.u32 (!%p1678_p11), %s145_s23, 6 }
  0x46   : > { %s146_s18 = scalar_lea.sflag (!%p1678_p11), [#allocation3], %s145_s23  ;;  %s1398_s26 = scalar_lea.vmem (!%p1678_p11), [#allocation2], %s1010_s24 }
  0x4c   : > { %1231 = dma.done.wait (%p1679_p13), %s146_s18, 1024  }
  0x4d   : > { %1233 = vsyncadd (%p1679_p13), %s146_s18, 4294966272  ;;  %p1680_p3 = scmp.ne.s32.totalorder %s1673_s14, 0 }
  0x4f   : > { %1235 = dma.done.wait (%p1680_p3), [#allocation5], 768  }
  0x50   : > { %1237 = vsyncadd (%p1680_p3), [#allocation5], 4294966528  ;;  %vm201_vm0 = vcmask 261120   ;;  %v184_v0 = vld [vmem:[#allocation4] sm:$0xff]  ;;  %v185_v1 = vld [vmem:[#allocation4 + $0x8] sm:$0xff]  ;;  %s1012_s14 = sshll.u32 %s1001_s13, 3 }
  0x51   : > { %v186_v2 = vld [vmem:[#allocation4 + $0x10] sm:$0xff]  ;;  %v1060_v3 = vpack.c.bf16 %v185_v1, %v184_v0  ;;  %v187_v4 = vld [vmem:[#allocation4 + $0x18] sm:$0xff]  ;;  %v189_v5 = vld [vmem:[%s1398_s26] sm:$0xff]  ;;  %p176_p7 = scmp.lt.s32.totalorder %s1012_s14, 15 }
  0x52   : > { %v193_v6 = vld [vmem:[%s1398_s26 + $0x20] sm:$0xff]  ;;  %v1064_v7 = vpack.c.bf16 %v187_v4, %v186_v2  ;;  %1048 = vmatprep.mubr.msk.f32.mxu0 %vm201_vm0, %v189_v5  ;;  %v190_v8 = vld [vmem:[%s1398_s26 + $0x8] sm:$0xff]  ;;  %v191_v10 = vld [vmem:[%s1398_s26 + $0x10] sm:$0xff] }
  0x53   : > { %1054 = vmatprep.mubr.msk.f32.mxu1 %vm201_vm0, %v193_v6  ;;  %1061 = vmatprep.subr.bf16.mxu0 %v1060_v3  ;;  %v194_v9 = vld [vmem:[%s1398_s26 + $0x28] sm:$0xff]  ;;  %v195_v11 = vld [vmem:[%s1398_s26 + $0x30] sm:$0xff]  ;;  %v192_v12 = vld [vmem:[%s1398_s26 + $0x18] sm:$0xff]  ;;  %s1686_s14 = smov (!%p176_p7, %s1012_s14), 15 }
  0x54   : > { %1068 = vmatprep.subr.bf16.mxu1 %v1060_v3  ;;  %1063 = vmatpush3.bf16.msra.mxu0 %v1060_v3  ;;  %v196_v13 = vld [vmem:[%s1398_s26 + $0x38] sm:$0xff]  ;;  %v1014_v14 = vld [vmem:[#allocation4 + $0x20] ss:$0 sm:$0xff]  ;;  %s1013_s15 = sshll.u32 %s1686_s14, 3 }
  0x55   : > { %1070 = vmatpush3.bf16.msra.mxu1 %v1060_v3  ;;  %1065 = vmatprep.subr.bf16.mxu0 %v1064_v7  ;;  %s179_s4 = scalar_lea.vmem %s1668_s2, %s1013_s15 }
  0x56   : > { %1069 = vmatprep.subr.bf16.mxu1 %v1064_v7 }
  0x58   : > { %1067 = vmatpush3.bf16.msra.mxu0 %v1064_v7 }
  0x59   : > { %1071 = vmatpush3.bf16.msra.mxu1 %v1064_v7 }
  0x5b   : > { %1049 = vmatmul.mubr.msk.f32.vlgmr.msra.gmra.mrb[0].mxu0 %vm201_vm0, %v190_v8 }
  0x5c   : > { %1055 = vmatmul.mubr.msk.f32.vlgmr.msra.gmra.mrb[0].mxu1 %vm201_vm0, %v194_v9  ;;  %1051 = vmatprep.mubr.msk.f32.mxu0 %vm201_vm0, %v191_v10 }
  0x5d   : > { %1057 = vmatprep.mubr.msk.f32.mxu1 %vm201_vm0, %v195_v11 }
  0x5f   : > { %1052 = vmatmul.mubr.msk.f32.gmra.mrb[2].mxu0 %vm201_vm0, %v192_v12 }
  0x60   : > { %1058 = vmatmul.mubr.msk.f32.gmra.mrb[2].mxu1 %vm201_vm0, %v196_v13 }
 0x12e   : > { %v1050_v15 = vpop.f32.mrb[0].mxu0 }
 0x12f   : > { %v1056_v16 = vpop.f32.mrb[0].mxu1  ;;  %v1424_v17 = vadd.f32 %v1050_v15, %v1014_v14  ;;  %v292_v19 = vpop.f32.mrb[1].mxu0 }
 0x130   : > { %v1426_v18 = vadd.f32 %v1056_v16, %v1014_v14  ;;  %v312_v20 = vpop.f32.mrb[1].mxu1  ;;  %v1428_v21 = vadd.f32 %v1014_v14, %v292_v19 }
 0x131   : > { %v1430_v22 = vadd.f32 %v1014_v14, %v312_v20  ;;  %v339_v23 = vrot.slane %v1424_v17, 4 }
 0x132   : > { %v363_v24 = vrot.slane %v1426_v18, 4  ;;  %v333_v25 = vrot.slane %v1428_v21, 4  ;;  %v1053_v27 = vpop.f32.mrb[2].mxu0 }
 0x133   : > { %v357_v26 = vrot.slane %v1430_v22, 4  ;;  %v1059_v28 = vpop.f32.mrb[2].mxu1  ;;  %v340_v29 = vadd.f32 %v339_v23, %v1424_v17  ;;  %v1438_v31 = vadd.f32 %v1053_v27, %v1014_v14  ;;  %v302_v33 = vpop.f32.mrb[3].mxu0 }
 0x134   : > { %v364_v30 = vadd.f32 %v363_v24, %v1426_v18  ;;  %v1440_v32 = vadd.f32 %v1059_v28, %v1014_v14  ;;  %v322_v34 = vpop.f32.mrb[3].mxu1  ;;  %v334_v35 = vadd.f32 %v333_v25, %v1428_v21  ;;  %v1444_v37 = vadd.f32 %v1014_v14, %v302_v33 }
 0x135   : > { %v358_v36 = vadd.f32 %v357_v26, %v1430_v22  ;;  %v1446_v38 = vadd.f32 %v1014_v14, %v322_v34  ;;  %v341_v39 = vrot.slane %v340_v29, 2  ;;  %v351_v41 = vrot.slane %v1438_v31, 4 }
 0x136   : > { %v365_v40 = vrot.slane %v364_v30, 2  ;;  %v375_v42 = vrot.slane %v1440_v32, 4  ;;  %v335_v43 = vrot.slane %v334_v35, 2  ;;  %v345_v45 = vrot.slane %v1444_v37, 4 }
 0x137   : > { %v359_v44 = vrot.slane %v358_v36, 2  ;;  %v369_v46 = vrot.slane %v1446_v38, 4  ;;  %v342_v47 = vadd.f32 %v341_v39, %v340_v29  ;;  %v352_v49 = vadd.f32 %v351_v41, %v1438_v31 }
 0x138   : > { %v366_v48 = vadd.f32 %v365_v40, %v364_v30  ;;  %v376_v50 = vadd.f32 %v375_v42, %v1440_v32  ;;  %v336_v51 = vadd.f32 %v335_v43, %v334_v35  ;;  %v346_v53 = vadd.f32 %v345_v45, %v1444_v37 }
 0x139   : > { %v360_v52 = vadd.f32 %v359_v44, %v358_v36  ;;  %v370_v54 = vadd.f32 %v369_v46, %v1446_v38  ;;  %v343_v55 = vrot.slane %v342_v47, 1  ;;  %v353_v57 = vrot.slane %v352_v49, 2 }
 0x13a   : > { %v367_v56 = vrot.slane %v366_v48, 1  ;;  %v377_v58 = vrot.slane %v376_v50, 2  ;;  %v337_v59 = vrot.slane %v336_v51, 1  ;;  %v347_v61 = vrot.slane %v346_v53, 2 }
 0x13b   : > { %v361_v60 = vrot.slane %v360_v52, 1  ;;  %v371_v62 = vrot.slane %v370_v54, 2  ;;  %v344_v63 = vadd.f32 %v343_v55, %v342_v47  ;;  %v354_v1 = vadd.f32 %v353_v57, %v352_v49 }
 0x13c   : > { %v368_v0 = vadd.f32 %v367_v56, %v366_v48  ;;  %v378_v2 = vadd.f32 %v377_v58, %v376_v50  ;;  %v338_v3 = vadd.f32 %v337_v59, %v336_v51  ;;  %v348_v5 = vadd.f32 %v347_v61, %v346_v53 }
 0x13d   : > { %v362_v4 = vadd.f32 %v361_v60, %v360_v52  ;;  %v372_v6 = vadd.f32 %v371_v62, %v370_v54  ;;  %v1456_v7 = vmul.f32 0.125, %v344_v63  ;;  %v355_v9 = vrot.slane %v354_v1, 1 }
 0x13e   : > { %v1458_v8 = vmul.f32 0.125, %v368_v0  ;;  %v379_v10 = vrot.slane %v378_v2, 1  ;;  %v1460_v11 = vmul.f32 0.125, %v338_v3  ;;  %v349_v13 = vrot.slane %v348_v5, 1 }
 0x13f   : > { %v1462_v12 = vmul.f32 0.125, %v362_v4  ;;  %v373_v14 = vrot.slane %v372_v6, 1  ;;  %v391_v15 = vsub.f32 %v1424_v17, %v1456_v7  ;;  %v356_v19 = vadd.f32 %v355_v9, %v354_v1 }
 0x140   : > { %v395_v16 = vsub.f32 %v1426_v18, %v1458_v8  ;;  %v380_v20 = vadd.f32 %v379_v10, %v378_v2  ;;  %v390_v23 = vsub.f32 %v1428_v21, %v1460_v11  ;;  %v350_v25 = vadd.f32 %v349_v13, %v348_v5 }
 0x141   : > { %v394_v24 = vsub.f32 %v1430_v22, %v1462_v12  ;;  %v374_v26 = vadd.f32 %v373_v14, %v372_v6  ;;  %v399_v27 = vmul.f32 %v391_v15, %v391_v15  ;;  %v1472_v29 = vmul.f32 0.125, %v356_v19 }
 0x142   : > { %v403_v28 = vmul.f32 %v395_v16, %v395_v16  ;;  %v1474_v30 = vmul.f32 0.125, %v380_v20  ;;  %v398_v33 = vmul.f32 %v390_v23, %v390_v23  ;;  %v1476_v35 = vmul.f32 0.125, %v350_v25 }
 0x143   : > { %v402_v34 = vmul.f32 %v394_v24, %v394_v24  ;;  %v1478_v36 = vmul.f32 0.125, %v374_v26  ;;  %v412_v39 = vrot.slane %v399_v27, 4  ;;  %v393_v41 = vsub.f32 %v1438_v31, %v1472_v29 }
 0x144   : > { %v436_v40 = vrot.slane %v403_v28, 4  ;;  %v397_v42 = vsub.f32 %v1440_v32, %v1474_v30  ;;  %v406_v43 = vrot.slane %v398_v33, 4  ;;  %v392_v45 = vsub.f32 %v1444_v37, %v1476_v35 }
 0x145   : > { %v430_v44 = vrot.slane %v402_v34, 4  ;;  %v396_v46 = vsub.f32 %v1446_v38, %v1478_v36  ;;  %v413_v47 = vadd.f32 %v412_v39, %v399_v27  ;;  %v401_v49 = vmul.f32 %v393_v41, %v393_v41 }
 0x146   : > { %v437_v48 = vadd.f32 %v436_v40, %v403_v28  ;;  %v405_v50 = vmul.f32 %v397_v42, %v397_v42  ;;  %v407_v51 = vadd.f32 %v406_v43, %v398_v33  ;;  %v400_v53 = vmul.f32 %v392_v45, %v392_v45 }
 0x147   : > { %v431_v52 = vadd.f32 %v430_v44, %v402_v34  ;;  %v404_v54 = vmul.f32 %v396_v46, %v396_v46  ;;  %v414_v55 = vrot.slane %v413_v47, 2  ;;  %v424_v57 = vrot.slane %v401_v49, 4 }
 0x148   : > { %v438_v56 = vrot.slane %v437_v48, 2  ;;  %v448_v58 = vrot.slane %v405_v50, 4  ;;  %v408_v59 = vrot.slane %v407_v51, 2  ;;  %v418_v61 = vrot.slane %v400_v53, 4 }
 0x149   : > { %v432_v60 = vrot.slane %v431_v52, 2  ;;  %v442_v62 = vrot.slane %v404_v54, 4  ;;  %v415_v63 = vadd.f32 %v414_v55, %v413_v47  ;;  %v425_v1 = vadd.f32 %v424_v57, %v401_v49 }
 0x14a   : > { %v439_v0 = vadd.f32 %v438_v56, %v437_v48  ;;  %v449_v2 = vadd.f32 %v448_v58, %v405_v50  ;;  %v409_v3 = vadd.f32 %v408_v59, %v407_v51  ;;  %v419_v5 = vadd.f32 %v418_v61, %v400_v53 }
 0x14b   : > { %v433_v4 = vadd.f32 %v432_v60, %v431_v52  ;;  %v443_v6 = vadd.f32 %v442_v62, %v404_v54  ;;  %v416_v9 = vrot.slane %v415_v63, 1  ;;  %v426_v13 = vrot.slane %v425_v1, 2 }
 0x14c   : > { %v440_v10 = vrot.slane %v439_v0, 1  ;;  %v450_v14 = vrot.slane %v449_v2, 2  ;;  %v410_v15 = vrot.slane %v409_v3, 1  ;;  %v420_v19 = vrot.slane %v419_v5, 2 }
 0x14d   : > { %v434_v16 = vrot.slane %v433_v4, 1  ;;  %v444_v20 = vrot.slane %v443_v6, 2  ;;  %v417_v23 = vadd.f32 %v416_v9, %v415_v63  ;;  %v427_v25 = vadd.f32 %v426_v13, %v425_v1  ;;  %v331_v1 = vld [vmem:[#allocation4 + $0x25] sm:$0x1]  ;;  %v1491_v9 = vld [vmem:[#allocation4 + $0x2a] sm:$0x1] }
 0x14e   : > { %v441_v24 = vadd.f32 %v440_v10, %v439_v0  ;;  %v451_v26 = vadd.f32 %v450_v14, %v449_v2  ;;  %v411_v27 = vadd.f32 %v410_v15, %v409_v3  ;;  %v421_v33 = vadd.f32 %v420_v19, %v419_v5 }
 0x14f   : > { %v435_v28 = vadd.f32 %v434_v16, %v433_v4  ;;  %v445_v34 = vadd.f32 %v444_v20, %v443_v6  ;;  %v455_v39 = vmul.f32 0.125, %v417_v23  ;;  %v428_v41 = vrot.slane %v427_v25, 1 }
 0x150   : > { %v459_v40 = vmul.f32 0.125, %v441_v24  ;;  %v452_v42 = vrot.slane %v451_v26, 1  ;;  %v454_v43 = vmul.f32 0.125, %v411_v27  ;;  %v422_v45 = vrot.slane %v421_v33, 1 }
 0x151   : > { %v458_v44 = vmul.f32 0.125, %v435_v28  ;;  %v446_v46 = vrot.slane %v445_v34, 1  ;;  %v463_v47 = vadd.f32 1e-05, %v455_v39  ;;  %v429_v49 = vadd.f32 %v428_v41, %v427_v25 }
 0x152   : > { %v467_v48 = vadd.f32 1e-05, %v459_v40  ;;  %v453_v50 = vadd.f32 %v452_v42, %v451_v26  ;;  %v462_v51 = vadd.f32 1e-05, %v454_v43  ;;  %v423_v53 = vadd.f32 %v422_v45, %v421_v33 }
 0x153   : > { %v466_v52 = vadd.f32 1e-05, %v458_v44  ;;  %v447_v54 = vadd.f32 %v446_v46, %v445_v34  ;;  %1124 = vrsqrt.f32 %v463_v47  ;;  %v457_v55 = vmul.f32 0.125, %v429_v49 }
 0x154   : > { %1126 = vrsqrt.f32 %v467_v48  ;;  %v461_v56 = vmul.f32 0.125, %v453_v50  ;;  %v456_v57 = vmul.f32 0.125, %v423_v53  ;;  %v181_v58 = vlaneseq }
 0x155   : > { %1128 = vrsqrt.f32 %v462_v51  ;;  %v465_v59 = vadd.f32 1e-05, %v457_v55  ;;  %v460_v60 = vmul.f32 0.125, %v447_v54 }
 0x156   : > { %1130 = vrsqrt.f32 %v466_v52  ;;  %v464_v61 = vadd.f32 1e-05, %v456_v57  ;;  %v469_v62 = vadd.f32 1e-05, %v461_v56  ;;  %v503_v63 = vshrl.u32 %v181_v58, 7 }
 0x157   : > { %1132 = vrsqrt.f32 %v465_v59  ;;  %v468_v0 = vadd.f32 1e-05, %v460_v60 }
 0x158   : > { %1134 = vrsqrt.f32 %v464_v61  ;;  %v1489_v2 = vsub.s32 0, %v503_v63 }
 0x159   : > { %1136 = vrsqrt.f32 %v469_v62 }
 0x15a   : > { %1138 = vrsqrt.f32 %v468_v0 }
 0x15d   : > { %v1125_v3 = vpop.eup %1124 }
 0x15e   : > { %v1127_v4 = vpop.eup %1126  ;;  %v479_v5 = vmul.f32 %v1125_v3, %v331_v1 }
 0x15f   : > { %v1129_v6 = vpop.eup %1128  ;;  %v483_v10 = vmul.f32 %v1127_v4, %v331_v1 }
 0x160   : > { %v1131_v13 = vpop.eup %1130  ;;  %v487_v14 = vmul.f32 %v479_v5, %v1456_v7  ;;  %v509_v15 = vrot.slane %v479_v5, %v1489_v2  ;;  %v478_v16 = vmul.f32 %v1129_v6, %v331_v1 }
 0x161   : > { %v1133_v19 = vpop.eup %1132  ;;  %v491_v20 = vmul.f32 %v483_v10, %v1458_v8  ;;  %v525_v23 = vrot.slane %v483_v10, %v1489_v2  ;;  %v482_v24 = vmul.f32 %v1131_v13, %v331_v1 }
 0x162   : > { %v495_v25 = vsub.f32 %v1491_v9, %v487_v14  ;;  %v535_v26 = vmul.f32 %v509_v15, %v1424_v17  ;;  %v481_v27 = vmul.f32 %v1133_v19, %v331_v1  ;;  %v486_v28 = vmul.f32 %v478_v16, %v1460_v11  ;;  %v1135_v33 = vpop.eup %1134 }
 0x163   : > { %v499_v34 = vsub.f32 %v1491_v9, %v491_v20  ;;  %v539_v7 = vmul.f32 %v525_v23, %v1426_v18  ;;  %v505_v39 = vrot.slane %v478_v16, %v1489_v2  ;;  %v490_v40 = vmul.f32 %v482_v24, %v1462_v12  ;;  %v1137_v18 = vpop.eup %1136 }
 0x164   : > { %v549_v8 = vrot.slane %v495_v25, %v1489_v2  ;;  %v489_v41 = vmul.f32 %v481_v27, %v1472_v29  ;;  %v517_v42 = vrot.slane %v481_v27, %v1489_v2  ;;  %v494_v17 = vsub.f32 %v1491_v9, %v486_v28  ;;  %v1139_v29 = vpop.eup %1138  ;;  %v1023_v25 = vld [vmem:[#allocation4 + $0x21] ss:$0 sm:$0xff] }
 0x165   : > { %v565_v43 = vrot.slane %v499_v34, %v1489_v2  ;;  %v534_v11 = vmul.f32 %v505_v39, %v1428_v21  ;;  %v480_v44 = vmul.f32 %v1135_v33, %v331_v1  ;;  %v498_v45 = vsub.f32 %v1491_v9, %v490_v40 }
 0x166   : > { %v575_v46 = vadd.f32 %v549_v8, %v535_v26  ;;  %v497_v47 = vsub.f32 %v1491_v9, %v489_v41  ;;  %v537_v12 = vmul.f32 %v517_v42, %v1438_v31  ;;  %v545_v48 = vrot.slane %v494_v17, %v1489_v2 }
 0x167   : > { %v579_v49 = vadd.f32 %v565_v43, %v539_v7  ;;  %v488_v50 = vmul.f32 %v480_v44, %v1476_v35  ;;  %v513_v51 = vrot.slane %v480_v44, %v1489_v2  ;;  %v521_v52 = vrot.slane %v482_v24, %v1489_v2 }
 0x168   : > { %v583_v21 = vmax.f32 %v575_v46, 0.0  ;;  %v557_v53 = vrot.slane %v497_v47, %v1489_v2  ;;  %v574_v54 = vadd.f32 %v545_v48, %v534_v11  ;;  %v561_v55 = vrot.slane %v498_v45, %v1489_v2 }
 0x169   : > { %v587_v56 = vmax.f32 %v579_v49, 0.0  ;;  %v496_v57 = vsub.f32 %v1491_v9, %v488_v50  ;;  %v538_v31 = vmul.f32 %v521_v52, %v1430_v22  ;;  %v485_v60 = vmul.f32 %v1137_v18, %v331_v1 }
 0x16a   : > { %592 = vadd.xlane.f32.xlu0 %v583_v21  ;;  %v577_v59 = vadd.f32 %v557_v53, %v537_v12  ;;  %v484_v61 = vmul.f32 %v1139_v29, %v331_v1  ;;  %v582_v35 = vmax.f32 %v574_v54, 0.0  ;;  %v536_v62 = vmul.f32 %v513_v51, %v1444_v37 }
 0x16b   : > { %600 = vadd.xlane.f32.xlu1 %v587_v56  ;;  %v553_v63 = vrot.slane %v496_v57, %v1489_v2  ;;  %v578_v0 = vadd.f32 %v561_v55, %v538_v31  ;;  %v493_v4 = vmul.f32 %v485_v60, %v1474_v30  ;;  %v533_v5 = vrot.slane %v485_v60, %v1489_v2 }
 0x16c   : > { %v585_v3 = vmax.f32 %v577_v59, 0.0  ;;  %v492_v6 = vmul.f32 %v484_v61, %v1478_v36  ;;  %v529_v22 = vrot.slane %v484_v61, %v1489_v2 }
 0x16d   : > { %v576_v10 = vadd.f32 %v553_v63, %v536_v62  ;;  %v501_v1 = vsub.f32 %v1491_v9, %v493_v4  ;;  %v586_v37 = vmax.f32 %v578_v0, 0.0  ;;  %v541_v14 = vmul.f32 %v533_v5, %v1440_v32 }
 0x16e   : > { %590 = vadd.xlane.f32.xlu0 %v582_v35  ;;  %v500_v13 = vsub.f32 %v1491_v9, %v492_v6  ;;  %v540_v30 = vmul.f32 %v529_v22, %v1446_v38  ;;  %v182_v9 = vand.u32 127, %v181_v58 }
 0x16f   : > { %596 = vadd.xlane.f32.xlu1 %v585_v3  ;;  %v573_v15 = vrot.slane %v501_v1, %v1489_v2  ;;  %v584_v19 = vmax.f32 %v576_v10, 0.0 }
 0x170   : > { %v569_v16 = vrot.slane %v500_v13, %v1489_v2  ;;  %vm183_vm1 = vcmp.lt.s32.totalorder %v182_v9, 10 }
 0x171   : > { %v581_v36 = vadd.f32 %v573_v15, %v541_v14 }
 0x172   : > { %598 = vadd.xlane.f32.xlu0 %v586_v37  ;;  %v580_v20 = vadd.f32 %v569_v16, %v540_v30 }
 0x173   : > { %594 = vadd.xlane.f32.xlu1 %v584_v19  ;;  %v589_v24 = vmax.f32 %v581_v36, 0.0 }
 0x174   : > { %v588_v23 = vmax.f32 %v580_v20, 0.0 }
 0x176   : > { %602 = vadd.xlane.f32.xlu0 %v588_v23 }
 0x177   : > { %604 = vadd.xlane.f32.xlu1 %v589_v24 }
 0x1f7   : > { %v593_v32 = vpop.xlane.xlu0 %592 }
 0x1f8   : > { %v601_v26 = vpop.xlane.xlu1 %600  ;;  %v612_v27 = vadd.f32 %v1023_v25, %v593_v32 }
 0x1f9   : > { %v616_v28 = vadd.f32 %v1023_v25, %v601_v26 }
 0x1fa   : > { %v1535_v38 = vsel %vm183_vm1, %v612_v27, 0.0 }
 0x1fb   : > { %v1538_v33 = vsel %vm183_vm1, %v616_v28, 0.0  ;;  %v637_v34 = vrot.slane %v1535_v38, 4  ;;  %v591_v7 = vpop.xlane.xlu0 %590 }
 0x1fc   : > { %v661_v39 = vrot.slane %v1538_v33, 4  ;;  %v597_v40 = vpop.xlane.xlu1 %596  ;;  %v611_v8 = vadd.f32 %v1023_v25, %v591_v7 }
 0x1fd   : > { %v638_v58 = vadd.f32 %v637_v34, %v1535_v38  ;;  %v614_v41 = vadd.f32 %v1023_v25, %v597_v40 }
 0x1fe   : > { %v662_v42 = vadd.f32 %v661_v39, %v1538_v33  ;;  %v1545_v17 = vsel %vm183_vm1, %v611_v8, 0.0 }
 0x1ff   : > { %v639_v43 = vrot.slane %v638_v58, 2  ;;  %v1548_v11 = vsel %vm183_vm1, %v614_v41, 0.0  ;;  %v631_v44 = vrot.slane %v1545_v17, 4  ;;  %v599_v45 = vpop.xlane.xlu0 %598 }
 0x200   : > { %v663_v18 = vrot.slane %v662_v42, 2  ;;  %v649_v46 = vrot.slane %v1548_v11, 4  ;;  %v595_v47 = vpop.xlane.xlu1 %594  ;;  %v615_v12 = vadd.f32 %v1023_v25, %v599_v45 }
 0x201   : > { %v640_v48 = vadd.f32 %v639_v43, %v638_v58  ;;  %v632_v29 = vadd.f32 %v631_v44, %v1545_v17  ;;  %v613_v49 = vadd.f32 %v1023_v25, %v595_v47 }
 0x202   : > { %v664_v50 = vadd.f32 %v663_v18, %v662_v42  ;;  %v650_v51 = vadd.f32 %v649_v46, %v1548_v11  ;;  %v1555_v52 = vsel %vm183_vm1, %v615_v12, 0.0 }
 0x203   : > { %v641_v21 = vrot.slane %v640_v48, 1  ;;  %v633_v53 = vrot.slane %v632_v29, 2  ;;  %v1558_v54 = vsel %vm183_vm1, %v613_v49, 0.0  ;;  %v655_v55 = vrot.slane %v1555_v52, 4  ;;  %v603_v56 = vpop.xlane.xlu0 %602 }
 0x204   : > { %v665_v57 = vrot.slane %v664_v50, 1  ;;  %v651_v31 = vrot.slane %v650_v51, 2  ;;  %v643_v59 = vrot.slane %v1558_v54, 4  ;;  %v605_v60 = vpop.xlane.xlu1 %604  ;;  %v617_v61 = vadd.f32 %v1023_v25, %v603_v56 }
 0x205   : > { %v642_v35 = vadd.f32 %v641_v21, %v640_v48  ;;  %v634_v62 = vadd.f32 %v633_v53, %v632_v29  ;;  %v656_v63 = vadd.f32 %v655_v55, %v1555_v52  ;;  %v618_v0 = vadd.f32 %v1023_v25, %v605_v60 }
 0x206   : > { %v666_v3 = vadd.f32 %v665_v57, %v664_v50  ;;  %v652_v4 = vadd.f32 %v651_v31, %v650_v51  ;;  %v644_v5 = vadd.f32 %v643_v59, %v1558_v54  ;;  %v1565_v6 = vsel %vm183_vm1, %v617_v61, 0.0 }
 0x207   : > { %v1567_v10 = vmul.f32 0.125, %v642_v35  ;;  %v635_v22 = vrot.slane %v634_v62, 1  ;;  %v657_v1 = vrot.slane %v656_v63, 2  ;;  %v1570_v13 = vsel %vm183_vm1, %v618_v0, 0.0 }
 0x208   : > { %v1572_v37 = vmul.f32 0.125, %v666_v3  ;;  %v653_v14 = vrot.slane %v652_v4, 1  ;;  %v645_v15 = vrot.slane %v644_v5, 2  ;;  %v673_v30 = vrot.slane %v1570_v13, 4 }
 0x209   : > { %v688_v16 = vsub.f32 %v1535_v38, %v1567_v10  ;;  %v636_v19 = vadd.f32 %v635_v22, %v634_v62  ;;  %v658_v36 = vadd.f32 %v657_v1, %v656_v63  ;;  %v667_v20 = vrot.slane %v1565_v6, 4 }
 0x20a   : > { %v692_v23 = vsub.f32 %v1538_v33, %v1572_v37  ;;  %v654_v24 = vadd.f32 %v653_v14, %v652_v4  ;;  %v646_v9 = vadd.f32 %v645_v15, %v644_v5  ;;  %v674_v25 = vadd.f32 %v673_v30, %v1570_v13 }
 0x20b   : > { %v696_v32 = vmul.f32 %v688_v16, %v688_v16  ;;  %v1581_v26 = vmul.f32 0.125, %v636_v19  ;;  %v659_v27 = vrot.slane %v658_v36, 1  ;;  %v668_v28 = vadd.f32 %v667_v20, %v1565_v6 }
 0x20c   : > { %v700_v34 = vmul.f32 %v692_v23, %v692_v23  ;;  %v1584_v7 = vmul.f32 0.125, %v654_v24  ;;  %v647_v39 = vrot.slane %v646_v9, 1  ;;  %v675_v40 = vrot.slane %v674_v25, 2 }
 0x20d   : > { %v709_v8 = vrot.slane %v696_v32, 4  ;;  %v687_v58 = vsub.f32 %v1545_v17, %v1581_v26  ;;  %v660_v41 = vadd.f32 %v659_v27, %v658_v36  ;;  %v669_v42 = vrot.slane %v668_v28, 2 }
 0x20e   : > { %v733_v43 = vrot.slane %v700_v34, 4  ;;  %v690_v44 = vsub.f32 %v1548_v11, %v1584_v7  ;;  %v648_v45 = vadd.f32 %v647_v39, %v646_v9  ;;  %v676_v18 = vadd.f32 %v675_v40, %v674_v25 }
 0x20f   : > { %v710_v46 = vadd.f32 %v709_v8, %v696_v32  ;;  %v695_v47 = vmul.f32 %v687_v58, %v687_v58  ;;  %v1590_v12 = vmul.f32 0.125, %v660_v41  ;;  %v670_v48 = vadd.f32 %v669_v42, %v668_v28 }
 0x210   : > { %v734_v29 = vadd.f32 %v733_v43, %v700_v34  ;;  %v698_v49 = vmul.f32 %v690_v44, %v690_v44  ;;  %v1592_v50 = vmul.f32 0.125, %v648_v45  ;;  %v677_v51 = vrot.slane %v676_v18, 1 }
 0x211   : > { %v711_v21 = vrot.slane %v710_v46, 2  ;;  %v703_v53 = vrot.slane %v695_v47, 4  ;;  %v691_v55 = vsub.f32 %v1555_v52, %v1590_v12  ;;  %v671_v56 = vrot.slane %v670_v48, 1 }
 0x212   : > { %v735_v57 = vrot.slane %v734_v29, 2  ;;  %v721_v31 = vrot.slane %v698_v49, 4  ;;  %v689_v59 = vsub.f32 %v1558_v54, %v1592_v50  ;;  %v678_v60 = vadd.f32 %v677_v51, %v676_v18 }
 0x213   : > { %v712_v61 = vadd.f32 %v711_v21, %v710_v46  ;;  %v704_v35 = vadd.f32 %v703_v53, %v695_v47  ;;  %v699_v62 = vmul.f32 %v691_v55, %v691_v55  ;;  %v672_v63 = vadd.f32 %v671_v56, %v670_v48 }
 0x214   : > { %v736_v0 = vadd.f32 %v735_v57, %v734_v29  ;;  %v722_v3 = vadd.f32 %v721_v31, %v698_v49  ;;  %v697_v4 = vmul.f32 %v689_v59, %v689_v59  ;;  %v1598_v5 = vmul.f32 0.125, %v678_v60 }
 0x215   : > { %v713_v22 = vrot.slane %v712_v61, 1  ;;  %v705_v1 = vrot.slane %v704_v35, 2  ;;  %v727_v14 = vrot.slane %v699_v62, 4  ;;  %v1600_v15 = vmul.f32 0.125, %v672_v63 }
 0x216   : > { %v737_v30 = vrot.slane %v736_v0, 1  ;;  %v723_v16 = vrot.slane %v722_v3, 2  ;;  %v715_v19 = vrot.slane %v697_v4, 4  ;;  %v694_v36 = vsub.f32 %v1570_v13, %v1598_v5 }
 0x217   : > { %v714_v20 = vadd.f32 %v713_v22, %v712_v61  ;;  %v706_v23 = vadd.f32 %v705_v1, %v704_v35  ;;  %v728_v24 = vadd.f32 %v727_v14, %v699_v62  ;;  %v693_v9 = vsub.f32 %v1565_v6, %v1600_v15 }
 0x218   : > { %v738_v25 = vadd.f32 %v737_v30, %v736_v0  ;;  %v724_v32 = vadd.f32 %v723_v16, %v722_v3  ;;  %v716_v27 = vadd.f32 %v715_v19, %v697_v4  ;;  %v702_v28 = vmul.f32 %v694_v36, %v694_v36  ;;  %v629_v19 = vld [vmem:[#allocation4 + $0x29] sm:$0x1] }
 0x219   : > { %v752_v34 = vmul.f32 0.125, %v714_v20  ;;  %v707_v39 = vrot.slane %v706_v23, 1  ;;  %v729_v40 = vrot.slane %v728_v24, 2  ;;  %v701_v8 = vmul.f32 %v693_v9, %v693_v9 }
 0x21a   : > { %v756_v58 = vmul.f32 0.125, %v738_v25  ;;  %v725_v41 = vrot.slane %v724_v32, 1  ;;  %v717_v42 = vrot.slane %v716_v27, 2  ;;  %v745_v43 = vrot.slane %v702_v28, 4 }
 0x21b   : > { %v760_v44 = vadd.f32 1e-05, %v752_v34  ;;  %v708_v45 = vadd.f32 %v707_v39, %v706_v23  ;;  %v730_v18 = vadd.f32 %v729_v40, %v728_v24  ;;  %v739_v46 = vrot.slane %v701_v8, 4 }
 0x21c   : > { %v764_v47 = vadd.f32 1e-05, %v756_v58  ;;  %v726_v48 = vadd.f32 %v725_v41, %v724_v32  ;;  %v718_v29 = vadd.f32 %v717_v42, %v716_v27  ;;  %v746_v49 = vadd.f32 %v745_v43, %v702_v28  ;;  %v1606_v27 = vld [vmem:[#allocation4 + $0x2e] sm:$0x1] }
 0x21d   : > { %1140 = vrsqrt.f32 %v760_v44  ;;  %v751_v51 = vmul.f32 0.125, %v708_v45  ;;  %v731_v21 = vrot.slane %v730_v18, 1  ;;  %v740_v53 = vadd.f32 %v739_v46, %v701_v8 }
 0x21e   : > { %1142 = vrsqrt.f32 %v764_v47  ;;  %v754_v55 = vmul.f32 0.125, %v726_v48  ;;  %v719_v56 = vrot.slane %v718_v29, 1  ;;  %v747_v57 = vrot.slane %v746_v49, 2 }
 0x21f   : > { %v759_v31 = vadd.f32 1e-05, %v751_v51  ;;  %v732_v59 = vadd.f32 %v731_v21, %v730_v18  ;;  %v741_v60 = vrot.slane %v740_v53, 2 }
 0x220   : > { %v762_v61 = vadd.f32 1e-05, %v754_v55  ;;  %v720_v35 = vadd.f32 %v719_v56, %v718_v29  ;;  %v748_v62 = vadd.f32 %v747_v57, %v746_v49 }
 0x221   : > { %1144 = vrsqrt.f32 %v759_v31  ;;  %v755_v63 = vmul.f32 0.125, %v732_v59  ;;  %v742_v0 = vadd.f32 %v741_v60, %v740_v53 }
 0x222   : > { %1146 = vrsqrt.f32 %v762_v61  ;;  %v753_v3 = vmul.f32 0.125, %v720_v35  ;;  %v749_v4 = vrot.slane %v748_v62, 1 }
 0x223   : > { %v763_v22 = vadd.f32 1e-05, %v755_v63  ;;  %v743_v1 = vrot.slane %v742_v0, 1 }
 0x224   : > { %v761_v14 = vadd.f32 1e-05, %v753_v3  ;;  %v750_v30 = vadd.f32 %v749_v4, %v748_v62 }
 0x225   : > { %1148 = vrsqrt.f32 %v763_v22  ;;  %v744_v16 = vadd.f32 %v743_v1, %v742_v0 }
 0x226   : > { %1150 = vrsqrt.f32 %v761_v14  ;;  %v758_v36 = vmul.f32 0.125, %v750_v30 }
 0x227   : > { %v1141_v20 = vpop.eup %1140  ;;  %v757_v23 = vmul.f32 0.125, %v744_v16 }
 0x228   : > { %v1143_v24 = vpop.eup %1142  ;;  %v766_v9 = vadd.f32 1e-05, %v758_v36  ;;  %v776_v25 = vmul.f32 %v1141_v20, %v629_v19 }
 0x229   : > { %v765_v32 = vadd.f32 1e-05, %v757_v23  ;;  %v780_v28 = vmul.f32 %v1143_v24, %v629_v19 }
 0x22a   : > { %1152 = vrsqrt.f32 %v766_v9  ;;  %v784_v34 = vmul.f32 %v776_v25, %v1567_v10  ;;  %v806_v39 = vrot.slane %v776_v25, %v1489_v2 }
 0x22b   : > { %v1145_v40 = vpop.eup %1144  ;;  %1154 = vrsqrt.f32 %v765_v32  ;;  %v788_v8 = vmul.f32 %v780_v28, %v1572_v37  ;;  %v822_v58 = vrot.slane %v780_v28, %v1489_v2 }
 0x22c   : > { %v1147_v41 = vpop.eup %1146  ;;  %v792_v42 = vsub.f32 %v1606_v27, %v784_v34  ;;  %v775_v43 = vmul.f32 %v1145_v40, %v629_v19  ;;  %v832_v18 = vmul.f32 %v806_v39, %v1535_v38 }
 0x22d   : > { %v796_v44 = vsub.f32 %v1606_v27, %v788_v8  ;;  %v778_v45 = vmul.f32 %v1147_v41, %v629_v19  ;;  %v836_v37 = vmul.f32 %v822_v58, %v1538_v33 }
 0x22e   : > { %v846_v46 = vrot.slane %v792_v42, %v1489_v2  ;;  %v783_v10 = vmul.f32 %v775_v43, %v1581_v26  ;;  %v802_v47 = vrot.slane %v775_v43, %v1489_v2 }
 0x22f   : > { %v1149_v48 = vpop.eup %1148  ;;  %v862_v29 = vrot.slane %v796_v44, %v1489_v2  ;;  %v786_v49 = vmul.f32 %v778_v45, %v1584_v7  ;;  %v814_v55 = vrot.slane %v778_v45, %v1489_v2 }
 0x230   : > { %v1151_v51 = vpop.eup %1150  ;;  %v872_v21 = vadd.f32 %v846_v46, %v832_v18  ;;  %v791_v53 = vsub.f32 %v1606_v27, %v783_v10  ;;  %v779_v38 = vmul.f32 %v1149_v48, %v629_v19  ;;  %v831_v57 = vmul.f32 %v802_v47, %v1545_v17 }
 0x231   : > { %v876_v56 = vadd.f32 %v862_v29, %v836_v37  ;;  %v794_v26 = vsub.f32 %v1606_v27, %v786_v49  ;;  %v777_v31 = vmul.f32 %v1151_v51, %v629_v19  ;;  %v834_v17 = vmul.f32 %v814_v55, %v1548_v11 }
 0x232   : > { %v880_v59 = vmax.f32 %v872_v21, 0.0  ;;  %v842_v33 = vrot.slane %v791_v53, %v1489_v2  ;;  %v787_v60 = vmul.f32 %v779_v38, %v1590_v12  ;;  %v818_v7 = vrot.slane %v779_v38, %v1489_v2 }
 0x233   : > { %v854_v61 = vrot.slane %v794_v26, %v1489_v2  ;;  %v785_v35 = vmul.f32 %v777_v31, %v1592_v50  ;;  %v810_v62 = vrot.slane %v777_v31, %v1489_v2  ;;  %v884_v22 = vmax.f32 %v876_v56, 0.0 }
 0x234   : > { %v1153_v63 = vpop.eup %1152  ;;  %889 = vadd.xlane.f32.xlu1 %v880_v59  ;;  %v871_v0 = vadd.f32 %v842_v33, %v831_v57  ;;  %v795_v3 = vsub.f32 %v1606_v27, %v787_v60  ;;  %v835_v1 = vmul.f32 %v818_v7, %v1555_v52 }
 0x235   : > { %v1155_v4 = vpop.eup %1154  ;;  %v782_v12 = vmul.f32 %v1153_v63, %v629_v19  ;;  %v793_v14 = vsub.f32 %v1606_v27, %v785_v35  ;;  %v874_v16 = vadd.f32 %v854_v61, %v834_v17  ;;  %v833_v11 = vmul.f32 %v810_v62, %v1558_v54 }
 0x236   : > { %v879_v30 = vmax.f32 %v871_v0, 0.0  ;;  %v858_v50 = vrot.slane %v795_v3, %v1489_v2  ;;  %v781_v36 = vmul.f32 %v1155_v4, %v629_v19 }
 0x237   : > { %v790_v20 = vmul.f32 %v782_v12, %v1598_v5  ;;  %v830_v23 = vrot.slane %v782_v12, %v1489_v2  ;;  %v850_v24 = vrot.slane %v793_v14, %v1489_v2  ;;  %v882_v28 = vmax.f32 %v874_v16, 0.0 }
 0x238   : > { %897 = vadd.xlane.f32.xlu1 %v884_v22  ;;  %887 = vadd.xlane.f32.xlu0 %v879_v30  ;;  %v875_v9 = vadd.f32 %v858_v50, %v835_v1  ;;  %v789_v52 = vmul.f32 %v781_v36, %v1600_v15  ;;  %v826_v25 = vrot.slane %v781_v36, %v1489_v2 }
 0x239   : > { %v798_v32 = vsub.f32 %v1606_v27, %v790_v20  ;;  %v873_v19 = vadd.f32 %v850_v24, %v833_v11  ;;  %v838_v39 = vmul.f32 %v830_v23, %v1570_v13  ;;  %v1024_v13 = vld [vmem:[#allocation4 + $0x2f] ss:$0 sm:$0xff] }
 0x23a   : > { %v883_v34 = vmax.f32 %v875_v9, 0.0  ;;  %v797_v5 = vsub.f32 %v1606_v27, %v789_v52  ;;  %v837_v40 = vmul.f32 %v826_v25, %v1565_v6 }
 0x23b   : > { %v870_v54 = vrot.slane %v798_v32, %v1489_v2  ;;  %v881_v58 = vmax.f32 %v873_v19, 0.0 }
 0x23c   : > { %893 = vadd.xlane.f32.xlu1 %v882_v28  ;;  %895 = vadd.xlane.f32.xlu0 %v883_v34  ;;  %v866_v15 = vrot.slane %v797_v5, %v1489_v2 }
 0x23d   : > { %v878_v8 = vadd.f32 %v870_v54, %v838_v39 }
 0x23e   : > { %v877_v41 = vadd.f32 %v866_v15, %v837_v40 }
 0x23f   : > { %v886_v42 = vmax.f32 %v878_v8, 0.0 }
 0x240   : > { %891 = vadd.xlane.f32.xlu0 %v881_v58  ;;  %v885_v43 = vmax.f32 %v877_v41, 0.0 }
 0x241   : > { %901 = vadd.xlane.f32.xlu1 %v886_v42 }
 0x244   : > { %899 = vadd.xlane.f32.xlu0 %v885_v43 }
 0x2c1   : > { %v890_v6 = vpop.xlane.xlu1 %889 }
 0x2c2   : > { %v909_v2 = vadd.f32 %v1024_v13, %v890_v6 }
 0x2c4   : > { %917 = vst [vmem:[%s179_s4 + $0x8] sm:$0xff] %v909_v2 }
 0x2c5   : > { %v898_v27 = vpop.xlane.xlu1 %897  ;;  %v888_v44 = vpop.xlane.xlu0 %887 }
 0x2c6   : > { %v913_v45 = vadd.f32 %v1024_v13, %v898_v27  ;;  %v908_v18 = vadd.f32 %v1024_v13, %v888_v44 }
 0x2c8   : > { %921 = vst [vmem:[%s179_s4 + $0x28] sm:$0xff] %v913_v45  ;;  %916 = vst [vmem:[%s179_s4] sm:$0xff] %v908_v18 }
 0x2c9   : > { %v894_v46 = vpop.xlane.xlu1 %893  ;;  %v896_v10 = vpop.xlane.xlu0 %895 }
 0x2ca   : > { %v911_v47 = vadd.f32 %v1024_v13, %v894_v46  ;;  %v912_v48 = vadd.f32 %v1024_v13, %v896_v10 }
 0x2cc   : > { %919 = vst [vmem:[%s179_s4 + $0x18] sm:$0xff] %v911_v47  ;;  %920 = vst [vmem:[%s179_s4 + $0x20] sm:$0xff] %v912_v48 }
 0x2cd   : > { %v892_v37 = vpop.xlane.xlu0 %891 }
 0x2ce   : > { %v902_v29 = vpop.xlane.xlu1 %901  ;;  %v910_v49 = vadd.f32 %v1024_v13, %v892_v37 }
 0x2cf   : > { %v915_v51 = vadd.f32 %v1024_v13, %v902_v29 }
 0x2d0   : > { %918 = vst [vmem:[%s179_s4 + $0x10] sm:$0xff] %v910_v49 }
 0x2d1   : > { %923 = vst [vmem:[%s179_s4 + $0x38] sm:$0xff] %v915_v51  ;;  %v900_v21 = vpop.xlane.xlu0 %899 }
 0x2d2   : > { %v914_v53 = vadd.f32 %v1024_v13, %v900_v21 }
 0x2d4   : > { %922 = vst [vmem:[%s179_s4 + $0x30] sm:$0xff] %v914_v53 }
 0x2d5 PF: > { %p13_p6 = scmp.ge.s32.totalorder %s1320_s20, 4   ;;  %s1681_s9 = smov %s1244_s10 }
 0x2d6   : > { %s1682_s10 = smov %s1248_s11  ;;  %s1683_s11 = smov %s1349_s7 }
 0x2d7   : > { %s1684_s12 = smov %s1320_s20  ;;  %15 = sbr.rel (!%p13_p6) target bundleno = 4 (0x4), region = 72 }
 0x2de   :  { %946 = vsyncpa [#allocation3], 1 }
 0x2df   :  { %948 = vsyncpa [#allocation3 + $0x1], 1 }
 0x2e0   :  { %949 = vsyncpa [#allocation5], 1 }

</bundles_post_ra>
